<compile_context>
chip_gen: v7x
topology: tpu7x:2x2x1
jax: 0.10.0
libtpu: 0.0.40
codegen_flags: <defaults>
</compile_context>

<pallas_src>
import functools

import jax
import jax.numpy as jnp
from jax import lax
from jax.experimental import pallas as pl
from jax.experimental.pallas import tpu as pltpu


def _round_up(n: int, m: int) -> int:
    return ((n + m - 1) // m) * m


def _vmem_capacity_bytes() -> int:
    """Physical VMEM per core; conservative fallback = v7x (64 MiB)."""
    try:
        return int(pltpu.get_tpu_info().vmem_capacity_bytes)
    except Exception:
        return 64 << 20


def _cls_head_kernel(x_ref, v_ref, gb_ref, o_ref, *, inv_temperature: float):
    x = x_ref[...]                                    # (tb, F)  native dtype
    v = v_ref[...]                                    # (tc, F)  native (possibly bf16) dtype
    gb = gb_ref[...].astype(jnp.float32)              # (2, tc)  [g; bias]
    g = gb[0:1, :]                                    # (1, tc)
    b = gb[1:2, :]                                    # (1, tc)

    # Per-class squared L2 norm of V rows, squared in f32 (no-op cast when V is f32) and
    # reduced on the MXU so the result is already lane-oriented (1, tc).
    vf = v.astype(jnp.float32)
    vsq = vf * vf                                     # (tc, F)
    ones_row = jnp.ones((1, vsq.shape[1]), dtype=vsq.dtype)
    sumsq = lax.dot_general(
        ones_row, vsq,
        dimension_numbers=(((1,), (1,)), ((), ())),
        preferred_element_type=jnp.float32)           # (1, tc)

    # Weight-norm scale with 1/temperature folded in; rsqrt runs on the EUP.
    # The tiny floor only affects exactly-zero (degenerate / padded) rows and keeps
    # zero-padded class columns finite (they are sliced off in the wrapper anyway).
    inv_t = jnp.float32(inv_temperature)
    scale = (g * inv_t) * lax.rsqrt(jnp.maximum(sumsq, jnp.float32(1e-36)))   # (1, tc)
    bias = b * inv_t                                                           # (1, tc)

    # x @ V.T as a transposed-RHS dot_general (MXU, f32 accumulation); V is untouched.
    logits = lax.dot_general(
        x, v,
        dimension_numbers=(((1,), (1,)), ((), ())),
        preferred_element_type=jnp.float32)           # (tb, tc)

    o_ref[...] = (logits * scale + bias).astype(o_ref.dtype)


def classifier_head(x, weight_v, weight_g, bias, *, temperature: float = 1.0,
                    weight_dtype=None, out_dtype=jnp.float32):
    """Forward of ClassifierHead.

    x:            (B, in_features)
    weight_v:     (num_classes, in_features)  -- weight_norm "v" parameter
    weight_g:     (num_classes, 1)            -- weight_norm "g" parameter
    bias:         (num_classes,)
    weight_dtype: optional streaming dtype for V (e.g. jnp.bfloat16) — halves HBM traffic
                  in this mem-bound kernel; the norm/scale math stays f32.
    """
    B, F = x.shape
    C, F2 = weight_v.shape
    assert F == F2

    if weight_dtype is not None:
        weight_v = weight_v.astype(weight_dtype)

    xb = jnp.dtype(x.dtype).itemsize
    vb = jnp.dtype(weight_v.dtype).itemsize
    ob = jnp.dtype(out_dtype).itemsize

    # ---- per-generation VMEM budget (v7x: 64 MiB physical, v5e/v6e: 128 MiB) ----
    phys = _vmem_capacity_bytes()
    tile_budget = int(phys * 0.45)            # leave headroom for compiler scratch / spills

    # ---- batch tile (sublane-aligned; tiled so large B never needs a resident (B, F) x) ----
    tb = min(512, _round_up(B, 8))
    while tb > 8 and 2 * tb * F * xb > tile_budget // 2:
        tb = max(8, _round_up(tb // 2, 8))
    B_pad = _round_up(B, tb)

    # ---- class tile: largest multiple of 128 (<= 2048) that fits double-buffered in budget,
    #      constrained to divide round_up(C, 128) so padding adds no extra HBM traffic. ----
    c128 = _round_up(C, 128)
    fixed = 2 * tb * F * xb                   # double-buffered x tile
    tc = 128
    for m in range(min(2048, c128) // 128, 0, -1):
        cand = m * 128
        if c128 % cand:
            continue
        usage = fixed + 2 * cand * F * vb + 2 * tb * cand * ob + 2 * 2 * cand * 4
        if usage <= tile_budget:
            tc = cand
            break
    C_pad = _round_up(C, tc)                  # == c128

    est = fixed + 2 * tc * F * vb + 2 * tb * tc * ob + 2 * 2 * tc * 4
    vmem_limit = int(min(phys - (4 << 20), max(2 * est + (8 << 20), 64 << 20)))
    vmem_limit = max(vmem_limit, est + (2 << 20))

    # ---- wrapper-side layout plumbing: merge g/bias into one (2, C) block, pad B / C ----
    gb = jnp.concatenate(
        [weight_g.reshape(1, C).astype(jnp.float32),
         bias.reshape(1, C).astype(jnp.float32)], axis=0)          # (2, C)
    if C_pad != C:
        weight_v = jnp.pad(weight_v, ((0, C_pad - C), (0, 0)))
        gb = jnp.pad(gb, ((0, 0), (0, C_pad - C)))
    if B_pad != B:
        x = jnp.pad(x, ((0, B_pad - B), (0, 0)))

    nb = B_pad // tb
    nc = C_pad // tc

    # ---- grid ordering: whichever re-reads fewer HBM bytes (inner axis streams) ----
    traffic_batch_outer = B_pad * F * xb + nb * C_pad * F * vb     # x once, V nb times
    traffic_class_outer = C_pad * F * vb + nc * B_pad * F * xb     # V once, x nc times
    if traffic_batch_outer <= traffic_class_outer:
        grid = (nb, nc)
        x_map = lambda i, j: (i, 0)
        v_map = lambda i, j: (j, 0)
        gb_map = lambda i, j: (0, j)
        o_map = lambda i, j: (i, j)
    else:
        grid = (nc, nb)
        x_map = lambda j, i: (i, 0)
        v_map = lambda j, i: (j, 0)
        gb_map = lambda j, i: (0, j)
        o_map = lambda j, i: (i, j)

    cost = pl.CostEstimate(
        flops=2 * B * C * F + 2 * C * F,
        transcendentals=C,
        bytes_accessed=C * F * vb + B * F * xb + B * C * ob + 2 * C * 4,
    )

    kernel = functools.partial(_cls_head_kernel,
                               inv_temperature=float(1.0 / temperature))
    out = pl.pallas_call(
        kernel,
        out_shape=jax.ShapeDtypeStruct((B_pad, C_pad), out_dtype),
        grid=grid,
        in_specs=[
            pl.BlockSpec((tb, F), x_map),      # x tile
            pl.BlockSpec((tc, F), v_map),      # V tile: streamed / double-buffered
            pl.BlockSpec((2, tc), gb_map),     # merged [g; bias] (single small DMA)
        ],
        out_specs=pl.BlockSpec((tb, tc), o_map),
        compiler_params=pltpu.CompilerParams(
            # Output tiles are fully independent -> both axes parallel (v7x 2-TC split).
            dimension_semantics=("parallel", "parallel"),
            vmem_limit_bytes=vmem_limit,
        ),
        cost_estimate=cost,
    )(x, weight_v, gb)

    return out[:B, :C]


def _reference(x, weight_v, weight_g, bias, temperature):
    norm = jnp.sqrt(jnp.sum(weight_v.astype(jnp.float32) ** 2, axis=1, keepdims=True))
    w = weight_v * (weight_g / norm)
    return (x @ w.T + bias) / temperature


if __name__ == "__main__":
    in_features = 128
    num_classes = 200      # non-multiple of 128 -> exercises class padding path
    batch = 6              # non-multiple of 8   -> exercises batch padding path
    temperature = 2.0

    key = jax.random.PRNGKey(0)
    kx, kv, kg, kb = jax.random.split(key, 4)

    x = jax.random.normal(kx, (batch, in_features), dtype=jnp.float32)
    # Deterministic synthetic parameters (shapes per nn.Linear(in_features, num_classes)
    # + weight_norm).
    weight_v = jax.random.normal(kv, (num_classes, in_features), dtype=jnp.float32) * 0.1
    weight_g = jax.random.uniform(kg, (num_classes, 1), dtype=jnp.float32,
                                  minval=0.5, maxval=1.5)
    bias = jax.random.normal(kb, (num_classes,), dtype=jnp.float32) * 0.01

    out = classifier_head(x, weight_v, weight_g, bias, temperature=temperature)
    out = jax.block_until_ready(out)

    ref = _reference(x, weight_v, weight_g, bias, temperature)
    assert out.shape == (batch, num_classes)
    assert jnp.allclose(out, ref, atol=1e-4, rtol=1e-4), "mismatch vs reference"

    print("KERNEL_OK")
</pallas_src>

<mosaic_0001>
module attributes {stable_mosaic.version = 11 : i64} {
  func.func @_cls_head_kernel(%arg0: i32, %arg1: i32, %arg2: memref<8x128xf32, #tpu.memory_space<vmem>>, %arg3: memref<256x128xf32, #tpu.memory_space<vmem>>, %arg4: memref<2x256xf32, #tpu.memory_space<vmem>>, %arg5: memref<8x256xf32, #tpu.memory_space<vmem>>) attributes {dimension_semantics = [#tpu.dimension_semantics<parallel>, #tpu.dimension_semantics<parallel>], iteration_bounds = array<i64: 1, 1>, scalar_prefetch = 0 : i64, scratch_operands = 0 : i64, tpu.core_type = #tpu.core_type<tc>, window_params = [{transform_indices = @transform_0, window_bounds = array<i64: 8, 128>}, {transform_indices = @transform_1, window_bounds = array<i64: 256, 128>}, {transform_indices = @transform_2, window_bounds = array<i64: 2, 256>}, {transform_indices = @transform_3, window_bounds = array<i64: 8, 256>}]} {
    %c0 = arith.constant 0 : index
    %c0_0 = arith.constant 0 : index
    %0 = vector.load %arg2[%c0, %c0_0] : memref<8x128xf32, #tpu.memory_space<vmem>>, vector<8x128xf32>
    %c0_1 = arith.constant 0 : index
    %c0_2 = arith.constant 0 : index
    %1 = vector.load %arg3[%c0_1, %c0_2] : memref<256x128xf32, #tpu.memory_space<vmem>>, vector<256x128xf32>
    %c0_3 = arith.constant 0 : index
    %c0_4 = arith.constant 0 : index
    %2 = vector.load %arg4[%c0_3, %c0_4] : memref<2x256xf32, #tpu.memory_space<vmem>>, vector<2x256xf32>
    %3 = vector.extract_strided_slice %2 {offsets = [0, 0], sizes = [1, 256], strides = [1, 1]} : vector<2x256xf32> to vector<1x256xf32>
    %4 = vector.extract_strided_slice %2 {offsets = [1, 0], sizes = [1, 256], strides = [1, 1]} : vector<2x256xf32> to vector<1x256xf32>
    %5 = arith.mulf %1, %1 : vector<256x128xf32>
    %cst = arith.constant 1.000000e+00 : f32
    %6 = vector.broadcast %cst : f32 to vector<1x128xf32>
    %cst_5 = arith.constant dense<0.000000e+00> : vector<1x256xf32>
    %7 = tpu.matmul %6, %5, %cst_5 {dimension_numbers = #tpu.dot_dimension_numbers<[1], [1], [0], [0], [0, 0, 1, 0], [], []>} : vector<1x128xf32>, vector<256x128xf32>, vector<1x256xf32> -> vector<1x256xf32>
    %cst_6 = arith.constant 5.000000e-01 : f32
    %8 = vector.broadcast %cst_6 : f32 to vector<1x256xf32>
    %9 = arith.mulf %3, %8 : vector<1x256xf32>
    %cst_7 = arith.constant 1.000000e-36 : f32
    %10 = vector.broadcast %cst_7 : f32 to vector<1x256xf32>
    %11 = arith.maximumf %7, %10 : vector<1x256xf32>
    %12 = math.rsqrt %11 : vector<1x256xf32>
    %13 = arith.mulf %9, %12 : vector<1x256xf32>
    %cst_8 = arith.constant 5.000000e-01 : f32
    %14 = vector.broadcast %cst_8 : f32 to vector<1x256xf32>
    %15 = arith.mulf %4, %14 : vector<1x256xf32>
    %cst_9 = arith.constant dense<0.000000e+00> : vector<8x256xf32>
    %16 = tpu.matmul %0, %1, %cst_9 {dimension_numbers = #tpu.dot_dimension_numbers<[1], [1], [0], [0], [0, 0, 1, 0], [], []>} : vector<8x128xf32>, vector<256x128xf32>, vector<8x256xf32> -> vector<8x256xf32>
    %17 = vector.broadcast %13 : vector<1x256xf32> to vector<8x256xf32>
    %18 = arith.mulf %16, %17 : vector<8x256xf32>
    %19 = vector.broadcast %15 : vector<1x256xf32> to vector<8x256xf32>
    %20 = arith.addf %18, %19 : vector<8x256xf32>
    %c0_10 = arith.constant 0 : index
    %c0_11 = arith.constant 0 : index
    %21 = vector.load %arg5[%c0_10, %c0_11] : memref<8x256xf32, #tpu.memory_space<vmem>>, vector<8x256xf32>
    tpu.vector_store %arg5[%c0_10, %c0_11], %20 {strides = array<i32>} : memref<8x256xf32, #tpu.memory_space<vmem>>, vector<8x256xf32>,
    return
  }
  func.func @transform_0(%arg0: i32, %arg1: i32) -> (i32, i32) {
    %c0_i32 = arith.constant 0 : i32
    %c0_i32_0 = arith.constant 0 : i32
    return %arg0, %c0_i32 : i32, i32
  }
  func.func @transform_1(%arg0: i32, %arg1: i32) -> (i32, i32) {
    %c0_i32 = arith.constant 0 : i32
    %c0_i32_0 = arith.constant 0 : i32
    return %arg1, %c0_i32 : i32, i32
  }
  func.func @transform_2(%arg0: i32, %arg1: i32) -> (i32, i32) {
    %c0_i32 = arith.constant 0 : i32
    %c0_i32_0 = arith.constant 0 : i32
    return %c0_i32, %arg1 : i32, i32
  }
  func.func @transform_3(%arg0: i32, %arg1: i32) -> (i32, i32) {
    %c0_i32 = arith.constant 0 : i32
    return %arg0, %arg1 : i32, i32
  }
}

</mosaic_0001>

<bundles_post_ra>
// kernel: tpu_custom_call.1
= control target key start
LH: loop header
LB: loop body
LE: loop exit
PB: predicated region body
PF: predicated region fallthrough
CT: control target
= control target key end

     0   :  { %8 = vsyncpa [#allocation3], 0  ;;  %s620_s0 = inlined_call_operand.hbm [shape: f32[8,128], index: 0, kind: input, shape index: {}]   ;;  %s621_s1 = inlined_call_operand.hbm [shape: f32[256,128], index: 1, kind: input, shape index: {}]   ;;  %s622_s2 = inlined_call_operand.vmem [shape: f32[2,256], index: 2, kind: input, shape index: {}]   ;;  %s623_s3 = inlined_call_operand.hbm [shape: f32[8,256], index: 3, kind: output, shape index: {}]  }
   0x1   :  { %9 = vsyncpa [#allocation6], 0 }
   0x2   :  { %10 = vsyncpa [#allocation4], 0  ;;  %s541_s12 = smov [#allocation2]   ;;  %s542_s14 = smov [#allocation5]  }
   0x3   :  { %s17_s13 = sshll.u32 %s541_s12, 4  ;;  %s26_s15 = sshll.u32 %s542_s14, 4  ;;  %s18_s13 = int_to_ptr.vmem [resolvable:$true] %s17_s13  ;;  %s568_s15 = int_to_ptr.vmem [resolvable:$true] %s26_s15 }
   0x4   :  { %s469_s18 = scalar_lea.hbm %s620_s0, 128 }
   0x5   :  { %p470_p0 = scmp.ne.s32.totalorder %s620_s0, %s469_s18  ;;  %p473_p1 = scmp.lt.u32.totalorder %s469_s18, %s620_s0 }
   0x7   :  { %p475_p2 = pnand %p473_p1, %p470_p0 }
   0x9   :  { %478 = shalt.err (!%p475_p2)
}
   0xa   :  { %s479_s23 = scalar_lea.vmem %s18_s13, 128  ;;  %p484_p4 = scmp.lt.s32.totalorder %s18_s13, %s18_s13 }
   0xb   :  { %p480_p3 = scmp.ne.s32.totalorder %s18_s13, %s479_s23  ;;  %p485_p5 = scmp.lt.s32.totalorder %s479_s23, %s479_s23 }
   0xd   :  { %p486_p6 = por %p485_p5, %p484_p4 }
   0xf   :  { %p487_p7 = pnand %p486_p6, %p480_p3 }
  0x11   :  { %490 = shalt.err (!%p487_p7)
}
  0x12   :  { %20 = dma.hbm_to_vmem [thread:$0]  %s620_s0, 128, %s18_s13, [#allocation3]  }
  0x13   :  { %s491_s28 = scalar_lea.hbm %s621_s1, 4096 }
  0x14   :  { %p492_p8 = scmp.ne.s32.totalorder %s621_s1, %s491_s28  ;;  %p495_p9 = scmp.lt.u32.totalorder %s491_s28, %s621_s1 }
  0x16   :  { %p497_p10 = pnand %p495_p9, %p492_p8 }
  0x18   :  { %500 = shalt.err (!%p497_p10)
}
  0x19   :  { %s501_s6 = scalar_lea.vmem %s568_s15, 4096  ;;  %p506_p12 = scmp.lt.s32.totalorder %s568_s15, %s568_s15 }
  0x1a   :  { %p502_p11 = scmp.ne.s32.totalorder %s568_s15, %s501_s6  ;;  %p507_p13 = scmp.lt.s32.totalorder %s501_s6, %s501_s6 }
  0x1c   :  { %p508_p0 = por %p507_p13, %p506_p12 }
  0x1e   :  { %p509_p1 = pnand %p508_p0, %p502_p11 }
  0x20   :  { %512 = shalt.err (!%p509_p1)
}
  0x21   :  { %s543_s0 = smov 128   ;;  %s544_s7 = smov 8  }
  0x22   :  { %32 = dma.hbm_to_vmem [thread:$0]  %s621_s1, 4096, %s568_s15, [#allocation6], %s543_s0, %s543_s0, %s544_s7  }
  0x23   :  { %535 = dma.done.wait [#allocation3], 128  }
  0x24   :  { %536 = vsyncadd [#allocation3], 4294967168 }
  0x25   :  { %537 = dma.done.wait [#allocation6], 4096  }
  0x26   :  { %538 = vsyncadd [#allocation6], 4294963200  ;;  %v545_v0 = vmov 1.0   ;;  %v58_v1 = vld [vmem:[#allocation5 + $0x80] sm:$0xff]  ;;  %v59_v2 = vld [vmem:[#allocation5 + $0x88] sm:$0xff] }
  0x27   :  { %358 = vmatprep.mubr.f32.mxu0 %v545_v0  ;;  %v42_v3 = vld [vmem:[#allocation5] sm:$0xff]  ;;  %v91_v4 = vmul.f32 %v58_v1, %v58_v1  ;;  %v92_v5 = vmul.f32 %v59_v2, %v59_v2  ;;  %v43_v6 = vld [vmem:[#allocation5 + $0x8] sm:$0xff]  ;;  %v60_v8 = vld [vmem:[#allocation5 + $0x90] sm:$0xff]  ;;  %v426_v10 = vpack.c.bf16 %v59_v2, %v58_v1 }
  0x28   :  { %v75_v7 = vmul.f32 %v42_v3, %v42_v3  ;;  %v61_v9 = vld [vmem:[#allocation5 + $0x98] sm:$0xff]  ;;  %v76_v11 = vmul.f32 %v43_v6, %v43_v6  ;;  %v93_v12 = vmul.f32 %v60_v8, %v60_v8  ;;  %v428_v14 = vpack.c.bf16 %v43_v6, %v42_v3  ;;  %v44_v16 = vld [vmem:[#allocation5 + $0x10] sm:$0xff]  ;;  %v62_v20 = vld [vmem:[#allocation5 + $0xa0] sm:$0xff] }
  0x29   :  { %v94_v13 = vmul.f32 %v61_v9, %v61_v9  ;;  %v394_v15 = vpack.c.bf16 %v92_v5, %v91_v4  ;;  %v45_v17 = vld [vmem:[#allocation5 + $0x18] sm:$0xff]  ;;  %427 = vmatprep.subr.bf16.mxu1 %v426_v10  ;;  %v63_v21 = vld [vmem:[#allocation5 + $0xa8] sm:$0xff]  ;;  %v77_v22 = vmul.f32 %v44_v16, %v44_v16  ;;  %v430_v24 = vpack.c.bf16 %v61_v9, %v60_v8  ;;  %v46_v32 = vld [vmem:[#allocation5 + $0x20] sm:$0xff] }
  0x2a   :  { %v396_v18 = vpack.c.bf16 %v76_v11, %v75_v7  ;;  %429 = vmatpush3.bf16.xpose.msra.mxu1 %v428_v14  ;;  %v78_v23 = vmul.f32 %v45_v17, %v45_v17  ;;  %v95_v25 = vmul.f32 %v62_v20, %v62_v20  ;;  %v96_v26 = vmul.f32 %v63_v21, %v63_v21  ;;  %v600_v30 = vld [vmem:[#allocation2] sm:$0xff]  ;;  %v47_v33 = vld [vmem:[#allocation5 + $0x28] sm:$0xff]  ;;  %v64_v34 = vld [vmem:[#allocation5 + $0xb0] sm:$0xff] }
  0x2b   :  { %v398_v19 = vpack.c.bf16 %v94_v13, %v93_v12  ;;  %395 = vmatprep.subr.bf16.mxu0 %v394_v15  ;;  %431 = vmatprep.subr.bf16.mxu1 %v430_v24  ;;  %v432_v27 = vpack.c.bf16 %v45_v17, %v44_v16  ;;  %v434_v28 = vpack.c.bf16 %v63_v21, %v62_v20  ;;  %v65_v35 = vld [vmem:[#allocation5 + $0xb8] sm:$0xff]  ;;  %v48_v44 = vld [vmem:[#allocation5 + $0x30] sm:$0xff]  ;;  %v66_v46 = vld [vmem:[#allocation5 + $0xc0] sm:$0xff] }
  0x2c   :  { %397 = vmatpush3.bf16.xpose.msra.mxu0 %v396_v18  ;;  %v400_v29 = vpack.c.bf16 %v78_v23, %v77_v22  ;;  %v402_v31 = vpack.c.bf16 %v96_v26, %v95_v25  ;;  %392 = vmatprep.mubr.f32.mxu1 %v600_v30  ;;  %v79_v36 = vmul.f32 %v46_v32, %v46_v32  ;;  %v49_v45 = vld [vmem:[#allocation5 + $0x38] sm:$0xff]  ;;  %v67_v47 = vld [vmem:[#allocation5 + $0xc8] sm:$0xff]  ;;  %v50_v56 = vld [vmem:[#allocation5 + $0x40] sm:$0xff] }
  0x2d   :  { %399 = vmatprep.subr.bf16.mxu0 %v398_v19  ;;  %v80_v37 = vmul.f32 %v47_v33, %v47_v33  ;;  %v97_v38 = vmul.f32 %v64_v34, %v64_v34  ;;  %v98_v39 = vmul.f32 %v65_v35, %v65_v35  ;;  %v436_v40 = vpack.c.bf16 %v47_v33, %v46_v32  ;;  %v51_v57 = vld [vmem:[#allocation5 + $0x48] sm:$0xff]  ;;  %v68_v58 = vld [vmem:[#allocation5 + $0xd0] sm:$0xff]  ;;  %v69_v59 = vld [vmem:[#allocation5 + $0xd8] sm:$0xff] }
  0x2e   :  { %v438_v41 = vpack.c.bf16 %v65_v35, %v64_v34  ;;  %v81_v48 = vmul.f32 %v48_v44, %v48_v44  ;;  %v82_v49 = vmul.f32 %v49_v45, %v49_v45  ;;  %v99_v50 = vmul.f32 %v66_v46, %v66_v46  ;;  %v52_v5 = vld [vmem:[#allocation5 + $0x50] sm:$0xff]  ;;  %v53_v6 = vld [vmem:[#allocation5 + $0x58] sm:$0xff]  ;;  %v70_v7 = vld [vmem:[#allocation5 + $0xe0] sm:$0xff] }
  0x2f   :  { %v404_v42 = vpack.c.bf16 %v80_v37, %v79_v36  ;;  %v406_v43 = vpack.c.bf16 %v98_v39, %v97_v38  ;;  %v100_v51 = vmul.f32 %v67_v47, %v67_v47  ;;  %v440_v52 = vpack.c.bf16 %v49_v45, %v48_v44  ;;  %v71_v8 = vld [vmem:[#allocation5 + $0xe8] sm:$0xff]  ;;  %v54_v17 = vld [vmem:[#allocation5 + $0x60] sm:$0xff]  ;;  %v72_v19 = vld [vmem:[#allocation5 + $0xf0] sm:$0xff] }
  0x30   :  { %v442_v53 = vpack.c.bf16 %v67_v47, %v66_v46  ;;  %v408_v54 = vpack.c.bf16 %v82_v49, %v81_v48  ;;  %v83_v60 = vmul.f32 %v50_v56, %v50_v56  ;;  %v84_v61 = vmul.f32 %v51_v57, %v51_v57  ;;  %v55_v18 = vld [vmem:[#allocation5 + $0x68] sm:$0xff]  ;;  %v73_v20 = vld [vmem:[#allocation5 + $0xf8] sm:$0xff] }
  0x31   :  { %v410_v55 = vpack.c.bf16 %v100_v51, %v99_v50  ;;  %v101_v62 = vmul.f32 %v68_v58, %v68_v58  ;;  %v102_v63 = vmul.f32 %v69_v59, %v69_v59  ;;  %v444_v1 = vpack.c.bf16 %v51_v57, %v50_v56  ;;  %v74_v47 = vld [vmem:[%s622_s2] sm:$0xf]  ;;  %s547_s2 = smov [#allocation7]  }
  0x32   :  { %433 = vmatpush3.bf16.xpose.msra.mxu1 %v432_v27  ;;  %v446_v2 = vpack.c.bf16 %v69_v59, %v68_v58  ;;  %v412_v3 = vpack.c.bf16 %v84_v61, %v83_v60  ;;  %v85_v9 = vmul.f32 %v52_v5, %v52_v5  ;;  %v86_v10 = vmul.f32 %v53_v6, %v53_v6  ;;  %s316_s11 = sshll.u32 %s547_s2, 4  ;;  %s317_s11 = int_to_ptr.vmem [resolvable:$true] %s316_s11 }
  0x33   :  { %435 = vmatprep.subr.bf16.mxu1 %v434_v28  ;;  %v414_v4 = vpack.c.bf16 %v102_v63, %v101_v62  ;;  %v103_v11 = vmul.f32 %v70_v7, %v70_v7  ;;  %v104_v12 = vmul.f32 %v71_v8, %v71_v8  ;;  %v448_v13 = vpack.c.bf16 %v53_v6, %v52_v5  ;;  %s513_s12 = scalar_lea.vmem %s317_s11, 256  ;;  %p518_p3 = scmp.lt.s32.totalorder %s317_s11, %s317_s11 }
  0x34   :  { %401 = vmatpush3.bf16.xpose.msra.mxu0 %v400_v29  ;;  %v450_v14 = vpack.c.bf16 %v71_v8, %v70_v7  ;;  %v416_v15 = vpack.c.bf16 %v86_v10, %v85_v9  ;;  %v87_v21 = vmul.f32 %v54_v17, %v54_v17  ;;  %v88_v22 = vmul.f32 %v55_v18, %v55_v18  ;;  %v56_v29 = vld [vmem:[#allocation5 + $0x70] sm:$0xff]  ;;  %p514_p2 = scmp.ne.s32.totalorder %s317_s11, %s513_s12  ;;  %p519_p4 = scmp.lt.s32.totalorder %s513_s12, %s513_s12 }
  0x35   :  { %403 = vmatprep.subr.bf16.mxu0 %v402_v31  ;;  %v418_v16 = vpack.c.bf16 %v104_v12, %v103_v11  ;;  %v105_v23 = vmul.f32 %v72_v19, %v72_v19  ;;  %v106_v24 = vmul.f32 %v73_v20, %v73_v20  ;;  %v452_v25 = vpack.c.bf16 %v55_v18, %v54_v17  ;;  %v57_v31 = vld [vmem:[#allocation5 + $0x78] sm:$0xff] }
  0x36   :  { %v454_v26 = vpack.c.bf16 %v73_v20, %v72_v19  ;;  %v420_v27 = vpack.c.bf16 %v88_v22, %v87_v21  ;;  %v89_v32 = vmul.f32 %v56_v29, %v56_v29  ;;  %v90_v33 = vmul.f32 %v57_v31, %v57_v31  ;;  %p520_p5 = por %p519_p4, %p518_p3 }
  0x37   :  { %v422_v28 = vpack.c.bf16 %v106_v24, %v105_v23  ;;  %v456_v34 = vpack.c.bf16 %v57_v31, %v56_v29  ;;  %v189_v44 = vlaneseq  ;;  %v178_v49 = vmul.f32 0.5, %v74_v47 }
  0x38   :  { %v424_v35 = vpack.c.bf16 %v90_v33, %v89_v32  ;;  %p521_p6 = pnand %p520_p5, %p514_p2 }
  0x39   :  { %v190_v46 = vshrl.u32 %v189_v44, 7 }
  0x3a   :  { %437 = vmatpush3.bf16.xpose.msra.mxu1 %v436_v40 }
  0x3b   :  { %439 = vmatprep.subr.bf16.mxu1 %v438_v41  ;;  %v290_v51 = vsub.s32 1, %v190_v46 }
  0x3c   :  { %405 = vmatpush3.bf16.xpose.msra.mxu0 %v404_v42  ;;  %v546_v42 = vmov 1983009808  }
  0x3d   :  { %407 = vmatprep.subr.bf16.mxu0 %v406_v43  ;;  %v187_v43 = vunpack.c.l.s4 %v546_v42  ;;  %v291_v57 = vrot.slane %v178_v49, %v290_v51 }
  0x3f   :  { %v188_v45 = vunpack.c.0.s8 %v187_v43  ;;  %v301_v62 = vrot.slane %v291_v57, %v290_v51 }
  0x41   :  { %v191_v48 = vsub.s32 %v188_v45, %v190_v46 }
  0x42   :  { %441 = vmatpush3.bf16.xpose.msra.mxu1 %v440_v52  ;;  %v294_v52 = vsub.s32 3, %v190_v46 }
  0x43   :  { %443 = vmatprep.subr.bf16.mxu1 %v442_v53 }
  0x44   :  { %409 = vmatpush3.bf16.xpose.msra.mxu0 %v408_v54  ;;  %v269_v54 = vsub.s32 0, %v190_v46  ;;  %v295_v58 = vrot.slane %v178_v49, %v294_v52 }
  0x45   :  { %411 = vmatprep.subr.bf16.mxu0 %v410_v55  ;;  %v273_v55 = vsub.s32 2, %v190_v46 }
  0x4a   :  { %445 = vmatpush3.bf16.xpose.msra.mxu1 %v444_v1  ;;  %v305_v1 = vrot.slane %v295_v58, %v290_v51 }
  0x4b   :  { %447 = vmatprep.subr.bf16.mxu1 %v446_v2 }
  0x4c   :  { %413 = vmatpush3.bf16.xpose.msra.mxu0 %v412_v3 }
  0x4d   :  { %415 = vmatprep.subr.bf16.mxu0 %v414_v4 }
  0x52   :  { %449 = vmatpush3.bf16.xpose.msra.mxu1 %v448_v13 }
  0x53   :  { %451 = vmatprep.subr.bf16.mxu1 %v450_v14 }
  0x54   :  { %417 = vmatpush3.bf16.xpose.msra.mxu0 %v416_v15 }
  0x55   :  { %419 = vmatprep.subr.bf16.mxu0 %v418_v16 }
  0x5a   :  { %453 = vmatpush3.bf16.xpose.msra.mxu1 %v452_v25 }
  0x5b   :  { %455 = vmatprep.subr.bf16.mxu1 %v454_v26 }
  0x5c   :  { %421 = vmatpush3.bf16.xpose.msra.mxu0 %v420_v27 }
  0x5d   :  { %423 = vmatprep.subr.bf16.mxu0 %v422_v28 }
  0x62   :  { %457 = vmatpush3.bf16.xpose.msra.mxu1 %v456_v34 }
  0x64   :  { %425 = vmatpush3.bf16.xpose.msra.mxu0 %v424_v35 }
  0x69   :  { %393 = vmatmul.mubr.f32.vlgmr.msra.gmra.mrb[0].mxu1 %v600_v30 }
  0x6b   :  { %359 = vmatmul.mubr.f32.vlgmr.msra.gmra.mrb[0].mxu0 %v545_v0 }
 0x13c   :  { %v261_v36 = vpop.f32.mrb[0].mxu1 }
 0x13d   :  { %v263_v37 = vpop.f32.mrb[1].mxu1 }
 0x13e   :  { %v173_v38 = vpop.f32.mrb[0].mxu0 }
 0x13f   :  { %v179_v39 = vmax.f32 %v173_v38, 1e-36  ;;  %v175_v40 = vpop.f32.mrb[1].mxu0 }
 0x140   :  { %v180_v41 = vmax.f32 %v175_v40, 1e-36 }
 0x141   :  { %465 = vrsqrt.f32 %v179_v39 }
 0x142   :  { %467 = vrsqrt.f32 %v180_v41 }
 0x14b   :  { %v466_v30 = vpop.eup %465 }
 0x14c   :  { %v468_v0 = vpop.eup %467 }
 0x14d   :  { %v185_v50 = vcombine.low %v466_v30, %v468_v0 }
 0x14f   :  { %v192_v53 = vrot.slane %v185_v50, %v191_v48 }
 0x151   :  { %v194_v56 = vmul.f32 %v192_v53, %v178_v49 }
 0x153   :  { %v270_v59 = vrot.slane %v194_v56, %v269_v54  ;;  %v274_v60 = vrot.slane %v194_v56, %v273_v55 }
 0x155   :  { %v280_v61 = vrot.slane %v270_v59, %v269_v54  ;;  %v284_v63 = vrot.slane %v274_v60, %v269_v54 }
 0x157   :  { %v285_v2 = vmul.f32 %v280_v61, %v261_v36  ;;  %v286_v3 = vmul.f32 %v284_v63, %v263_v37 }
 0x159   :  { %v306_v4 = vadd.f32 %v301_v62, %v285_v2  ;;  %v307_v5 = vadd.f32 %v305_v1, %v286_v3 }
 0x15b   :  { %308 = vst [vmem:[#allocation7] sm:$0xff] %v306_v4  ;;  %309 = vst [vmem:[#allocation7 + $0x8] sm:$0xff] %v307_v5 }
 0x15c   :  { %524 = shalt.err (!%p521_p6)
}
 0x15d   :  { %s525_s15 = scalar_lea.hbm %s623_s3, 256 }
 0x15e   :  { %p526_p7 = scmp.ne.s32.totalorder %s623_s3, %s525_s15  ;;  %p529_p8 = scmp.lt.u32.totalorder %s525_s15, %s623_s3 }
 0x160   :  { %p531_p9 = pnand %p529_p8, %p526_p7 }
 0x162   :  { %534 = shalt.err (!%p531_p9)
}
 0x163   :  { %319 = dma.vmem_to_hbm [thread:$0]  %s317_s11, 256, %s623_s3, [#allocation4]  }
 0x164   :  { %539 = dma.done.wait [#allocation4], 256  }
 0x165   :  { %540 = vsyncadd [#allocation4], 4294967040 }
 0x166   :  { %323 = vsyncpa [#allocation3], 1 }
 0x167   :  { %324 = vsyncpa [#allocation6], 1 }
 0x168   :  { %325 = vsyncpa [#allocation4], 1 }

</bundles_post_ra>
